<compile_context>
chip_gen: v7x
topology: tpu7x:2x2x1
jax: 0.10.0
libtpu: 0.0.40
codegen_flags: <defaults>
</compile_context>

<pallas_src>
import functools

import jax
import jax.numpy as jnp
from jax.experimental import pallas as pl
from jax.experimental.pallas import tpu as pltpu


def modulation_kernel(x_ref, w_ref, lat_ref, o_ref):
    # x_ref:   (tile_rows, pack*num_in)   lane-packed coordinate tile, one signal
    # w_ref:   (pack*num_in, pack*num_out) block-diagonal weight (grid-resident)
    # lat_ref: (1, pack*num_out)           per-signal modulation row (bias folded)
    # o_ref:   (tile_rows, pack*num_out)
    acc = jnp.dot(x_ref[...], w_ref[...], preferred_element_type=jnp.float32)
    o_ref[...] = (acc + lat_ref[...]).astype(o_ref.dtype)


def _round_up(x, m):
    return ((x + m - 1) // m) * m


def neural_modulation_field_forward(coords, patient_idx, params, *,
                                    tile_rows=4096, out_dtype=None):
    """coords: [B, N, num_in] f32, patient_idx: [B] int32 -> [B, N, num_out]."""
    W, b, latents = params["W"], params["b"], params["latents"]
    B, N, num_in = coords.shape
    num_out = W.shape[1]
    out_dtype = coords.dtype if out_dtype is None else out_dtype

    # ---- lane packing factor: pack rows so the input width hits 128 lanes ----
    pack = 128 // num_in if (num_in <= 128 and 128 % num_in == 0) else 1
    kin = pack * num_in       # packed input width   (128 for num_in=32)
    kout = pack * num_out     # packed output width  (256 for num_out=64)

    # ---- choose tile size (in packed rows) and pad the row axis ----
    n_pack = pl.cdiv(N, pack)
    tr = min(tile_rows, _round_up(n_pack, 8))
    if B == 1 and n_pack > 8:
        # keep >=2 grid steps so both v7x TensorCores get work
        tr = min(tr, _round_up(pl.cdiv(n_pack, 2), 8))
    tr = max(tr, 8)
    n_pack_padded = _round_up(n_pack, tr)
    n_padded = n_pack_padded * pack

    if n_padded != N:
        coords = jnp.pad(coords, ((0, 0), (0, n_padded - N), (0, 0)))

    # Free, contiguous reshape: 'pack' consecutive rows share one 128-lane row.
    coords_p = coords.reshape(B, n_pack_padded, kin)

    # Block-diagonal weight so each packed segment sees the same W.
    if pack > 1:
        W_p = jnp.kron(jnp.eye(pack, dtype=W.dtype), W)          # (kin, kout)
    else:
        W_p = W

    # Gather per-signal modulation rows, fold bias, tile across packed segments.
    lat_row = latents[patient_idx] + b[None, :]                   # (B, num_out)
    lat_p = jnp.tile(lat_row, (1, pack)).reshape(B, 1, kout)      # (B, 1, kout)

    grid = (B, n_pack_padded // tr)

    in_item = jnp.dtype(coords.dtype).itemsize
    out_item = jnp.dtype(out_dtype).itemsize
    bytes_accessed = (coords_p.size * in_item + W_p.size * in_item
                      + lat_p.size * in_item
                      + B * n_pack_padded * kout * out_item)

    out_p = pl.pallas_call(
        modulation_kernel,
        out_shape=jax.ShapeDtypeStruct((B, n_pack_padded, kout), out_dtype),
        grid_spec=pltpu.PrefetchScalarGridSpec(
            num_scalar_prefetch=0,
            grid=grid,
            in_specs=[
                # coords: one (tr, kin) lane-packed tile per (signal, tile) point
                pl.BlockSpec((None, tr, kin), lambda bi, j: (bi, j, 0)),
                # W: resident, same block for every grid point
                pl.BlockSpec((kin, kout), lambda bi, j: (0, 0)),
                # per-signal modulation row: indexed by the batch/signal axis only
                pl.BlockSpec((None, 1, kout), lambda bi, j: (bi, 0, 0)),
            ],
            out_specs=pl.BlockSpec((None, tr, kout), lambda bi, j: (bi, j, 0)),
        ),
        compiler_params=pltpu.CompilerParams(
            dimension_semantics=("parallel", "parallel"),
            vmem_limit_bytes=32 * 1024 * 1024,
        ),
        cost_estimate=pl.CostEstimate(
            flops=2 * B * n_pack_padded * kin * kout,
            transcendentals=0,
            bytes_accessed=int(bytes_accessed),
        ),
    )(coords_p, W_p, lat_p)

    # Unpack lanes back to (B, N, num_out); reshape is free, slice drops padding.
    out = out_p.reshape(B, n_padded, num_out)
    return out[:, :N, :]


def init_params(key, num_in, num_out, num_signals):
    k1, k2, k3 = jax.random.split(key, 3)
    return {
        "W": jax.random.normal(k1, (num_in, num_out), jnp.float32) * 0.1,
        "b": jax.random.normal(k2, (num_out,), jnp.float32) * 0.1,
        "latents": jax.random.normal(k3, (num_signals, num_out), jnp.float32) * 0.1,
    }


if __name__ == "__main__":
    # Small shapes consistent with the module's __init__ signature.
    B, N = 2, 200            # 2 signals in the batch, 200 sample points each (non-8-aligned on purpose)
    num_in, num_out = 32, 64
    num_signals = 4

    key = jax.random.PRNGKey(0)
    kx, kp = jax.random.split(key)
    params = init_params(kp, num_in, num_out, num_signals)

    coords = jax.random.normal(kx, (B, N, num_in), jnp.float32)
    patient_idx = jnp.array([1, 3], dtype=jnp.int32)

    fwd = jax.jit(functools.partial(neural_modulation_field_forward, params=params))
    out = fwd(coords, patient_idx)
    out = jax.block_until_ready(out)

    # pure-JAX reference check
    ref = (jnp.einsum("bni,io->bno", coords, params["W"])
           + params["b"][None, None, :]
           + params["latents"][patient_idx][:, None, :])
    assert out.shape == (B, N, num_out)
    assert jnp.allclose(out, ref, atol=1e-5, rtol=1e-5)

    print("KERNEL_OK")
</pallas_src>

<mosaic_0001>
module attributes {stable_mosaic.version = 11 : i64} {
  func.func @modulation_kernel(%arg0: i32, %arg1: i32, %arg2: memref<1x56x128xf32, #tpu.memory_space<vmem>>, %arg3: memref<128x256xf32, #tpu.memory_space<vmem>>, %arg4: memref<1x1x256xf32, #tpu.memory_space<vmem>>, %arg5: memref<1x56x256xf32, #tpu.memory_space<vmem>>) attributes {dimension_semantics = [#tpu.dimension_semantics<parallel>, #tpu.dimension_semantics<parallel>], iteration_bounds = array<i64: 2, 1>, scalar_prefetch = 0 : i64, scratch_operands = 0 : i64, tpu.core_type = #tpu.core_type<tc>, window_params = [{transform_indices = @transform_0, window_bounds = array<i64: 1, 56, 128>}, {pipeline_mode = #tpu.pipeline_mode<synchronous>, transform_indices = @transform_1, window_bounds = array<i64: 128, 256>}, {transform_indices = @transform_2, window_bounds = array<i64: 1, 1, 256>}, {transform_indices = @transform_3, window_bounds = array<i64: 1, 56, 256>}]} {
    %c0 = arith.constant 0 : index
    %c0_0 = arith.constant 0 : index
    %c0_1 = arith.constant 0 : index
    %0 = vector.load %arg2[%c0, %c0_0, %c0_1] : memref<1x56x128xf32, #tpu.memory_space<vmem>>, vector<1x56x128xf32>
    %1 = vector.shape_cast %0 : vector<1x56x128xf32> to vector<56x128xf32>
    %c0_2 = arith.constant 0 : index
    %c0_3 = arith.constant 0 : index
    %2 = vector.load %arg3[%c0_2, %c0_3] : memref<128x256xf32, #tpu.memory_space<vmem>>, vector<128x256xf32>
    %cst = arith.constant dense<0.000000e+00> : vector<56x256xf32>
    %3 = tpu.matmul %1, %2, %cst {dimension_numbers = #tpu.dot_dimension_numbers<[1], [0], [0], [1], [0, 0, 1, 1], [], []>} : vector<56x128xf32>, vector<128x256xf32>, vector<56x256xf32> -> vector<56x256xf32>
    %c0_4 = arith.constant 0 : index
    %c0_5 = arith.constant 0 : index
    %c0_6 = arith.constant 0 : index
    %4 = vector.load %arg4[%c0_4, %c0_5, %c0_6] : memref<1x1x256xf32, #tpu.memory_space<vmem>>, vector<1x1x256xf32>
    %5 = vector.shape_cast %4 : vector<1x1x256xf32> to vector<1x256xf32>
    %6 = vector.broadcast %5 : vector<1x256xf32> to vector<56x256xf32>
    %7 = arith.addf %3, %6 : vector<56x256xf32>
    %c0_7 = arith.constant 0 : index
    %c0_8 = arith.constant 0 : index
    %c0_9 = arith.constant 0 : index
    %8 = vector.load %arg5[%c0_7, %c0_8, %c0_9] : memref<1x56x256xf32, #tpu.memory_space<vmem>>, vector<1x56x256xf32>
    %9 = vector.shape_cast %8 : vector<1x56x256xf32> to vector<56x256xf32>
    %10 = vector.shape_cast %7 : vector<56x256xf32> to vector<1x56x256xf32>
    tpu.vector_store %arg5[%c0_7, %c0_8, %c0_9], %10 {strides = array<i32>} : memref<1x56x256xf32, #tpu.memory_space<vmem>>, vector<1x56x256xf32>,
    return
  }
  func.func @transform_0(%arg0: i32, %arg1: i32) -> (i32, i32, i32) {
    %c0_i32 = arith.constant 0 : i32
    %c0_i32_0 = arith.constant 0 : i32
    return %arg0, %arg1, %c0_i32 : i32, i32, i32
  }
  func.func @transform_1(%arg0: i32, %arg1: i32) -> (i32, i32) {
    %c0_i32 = arith.constant 0 : i32
    %c0_i32_0 = arith.constant 0 : i32
    %c0_i32_1 = arith.constant 0 : i32
    return %c0_i32, %c0_i32_0 : i32, i32
  }
  func.func @transform_2(%arg0: i32, %arg1: i32) -> (i32, i32, i32) {
    %c0_i32 = arith.constant 0 : i32
    %c0_i32_0 = arith.constant 0 : i32
    %c0_i32_1 = arith.constant 0 : i32
    return %arg0, %c0_i32, %c0_i32_0 : i32, i32, i32
  }
  func.func @transform_3(%arg0: i32, %arg1: i32) -> (i32, i32, i32) {
    %c0_i32 = arith.constant 0 : i32
    %c0_i32_0 = arith.constant 0 : i32
    return %arg0, %arg1, %c0_i32 : i32, i32, i32
  }
}

</mosaic_0001>

<bundles_post_ra>
// kernel: neural_modulation_field_forward.1
= control target key start
LH: loop header
LB: loop body
LE: loop exit
PB: predicated region body
PF: predicated region fallthrough
CT: control target
= control target key end

     0   :  { %s636_s12 = smov 0   ;;  %s638_s13 = smov 0   ;;  %s800_s0 = inlined_call_operand.vmem [shape: f32[2,56,128], index: 0, kind: input, shape index: {}]   ;;  %s801_s1 = inlined_call_operand.vmem [shape: f32[128,256], index: 1, kind: input, shape index: {}]   ;;  %s802_s2 = inlined_call_operand.vmem [shape: f32[2,1,256], index: 2, kind: input, shape index: {}]   ;;  %s803_s3 = inlined_call_operand.vmem [shape: f32[2,56,256], index: 3, kind: output, shape index: {}]  }
   0x1   :  { %s640_s14 = smov 0  }
   0x2 LB: > { %s25_s15 = sadd.s32 1, %s609_s13  ;;  %p510_p0 = scmp.ge.s32.totalorder %s613_s14, 1  ;;  %s613_s14 = sphi %s640_s14, %s13_s14   ;;  %s609_s13 = sphi %s638_s13, %s805_s13   ;;  %s605_s12 = sphi %s636_s12, %s804_s12  }
   0x3   : > { %p27_p1 = scmp.ge.s32.totalorder %s25_s15, 2  ;;  %p167_p2 = scmp.lt.s32.totalorder %s613_s14, 3 }
   0x5   : > { %s807_s15 = smov (%p27_p1, %s25_s15), 0  ;;  %p168_p3 = pnand %p510_p0, %p167_p2 }
   0x6   : > { %v237_v0 = vld [vmem:[%s801_s1 + $0x8] sm:$0xff] (!%p168_p3)  ;;  %v239_v1 = vld [vmem:[%s801_s1 + $0x18] sm:$0xff] (!%p168_p3)  ;;  %v236_v2 = vld [vmem:[%s801_s1] sm:$0xff] (!%p168_p3)  ;;  %v615_v7 = vmov (!%p168_p3), 0.0   ;;  %p205_p4 = scmp.lt.s32.totalorder (!%p168_p3), %s605_s12, 1  ;;  %v270_v56 = vlaneseq (!%p168_p3) }
   0x7   : > { %171 = sbr.rel (%p168_p3) target bundleno = 269 (0x10d), region = 32  ;;  %v516_v3 = vpack.c.bf16 (!%p168_p3), %v239_v1, %v237_v0  ;;  %v238_v4 = vld [vmem:[%s801_s1 + $0x10] sm:$0xff] (!%p168_p3)  ;;  %v241_v5 = vld [vmem:[%s801_s1 + $0x28] sm:$0xff] (!%p168_p3)  ;;  %v243_v6 = vld [vmem:[%s801_s1 + $0x38] sm:$0xff] (!%p168_p3)  ;;  %344 = vmatprep.mubr.f32.mxu0 (!%p168_p3), %v615_v7  ;;  %368 = vmatprep.mubr.f32.mxu1 (!%p168_p3), %v615_v7 }
   0x8   : > { %v518_v8 = vpack.c.bf16 (!%p168_p3), %v238_v4, %v236_v2  ;;  %v520_v9 = vpack.c.bf16 (!%p168_p3), %v243_v6, %v241_v5  ;;  %v240_v10 = vld [vmem:[%s801_s1 + $0x20] sm:$0xff] (!%p168_p3)  ;;  %v242_v11 = vld [vmem:[%s801_s1 + $0x30] sm:$0xff] (!%p168_p3)  ;;  %v245_v12 = vld [vmem:[%s801_s1 + $0x48] sm:$0xff] (!%p168_p3)  ;;  %v271_v57 = vshrl.u32 (!%p168_p3), %v270_v56, 7 }
   0x9   : > { %517 = vmatprep.subr.bf16.mxu0 (!%p168_p3), %v516_v3  ;;  %548 = vmatprep.subr.bf16.mxu1 (!%p168_p3), %v516_v3  ;;  %v247_v13 = vld [vmem:[%s801_s1 + $0x58] sm:$0xff] (!%p168_p3)  ;;  %v522_v14 = vpack.c.bf16 (!%p168_p3), %v242_v11, %v240_v10  ;;  %v244_v16 = vld [vmem:[%s801_s1 + $0x40] sm:$0xff] (!%p168_p3)  ;;  %v246_v17 = vld [vmem:[%s801_s1 + $0x50] sm:$0xff] (!%p168_p3) }
   0xa   : > { %519 = vmatpush1.bf16.msra.mxu0 (!%p168_p3), %v518_v8  ;;  %556 = vmatpush1.bf16.msra.mxu1 (!%p168_p3), %v518_v8  ;;  %v524_v15 = vpack.c.bf16 (!%p168_p3), %v247_v13, %v245_v12  ;;  %v249_v18 = vld [vmem:[%s801_s1 + $0x68] sm:$0xff] (!%p168_p3)  ;;  %v251_v19 = vld [vmem:[%s801_s1 + $0x78] sm:$0xff] (!%p168_p3)  ;;  %v526_v20 = vpack.c.bf16 (!%p168_p3), %v246_v17, %v244_v16  ;;  %v248_v22 = vld [vmem:[%s801_s1 + $0x60] sm:$0xff] (!%p168_p3)  ;;  %v272_v58 = vsub.s32 (!%p168_p3), 0, %v271_v57  ;;  %v276_v60 = vsub.s32 (!%p168_p3), 1, %v271_v57 }
   0xb   : > { %521 = vmatprep.subr.bf16.mxu0 (!%p168_p3), %v520_v9  ;;  %549 = vmatprep.subr.bf16.mxu1 (!%p168_p3), %v520_v9  ;;  %v528_v21 = vpack.c.bf16 (!%p168_p3), %v251_v19, %v249_v18  ;;  %v250_v23 = vld [vmem:[%s801_s1 + $0x70] sm:$0xff] (!%p168_p3)  ;;  %v253_v24 = vld [vmem:[%s801_s1 + $0x88] sm:$0xff] (!%p168_p3)  ;;  %v255_v25 = vld [vmem:[%s801_s1 + $0x98] sm:$0xff] (!%p168_p3) }
   0xc   : > { %v530_v26 = vpack.c.bf16 (!%p168_p3), %v250_v23, %v248_v22  ;;  %v532_v27 = vpack.c.bf16 (!%p168_p3), %v255_v25, %v253_v24  ;;  %v252_v28 = vld [vmem:[%s801_s1 + $0x80] sm:$0xff] (!%p168_p3)  ;;  %v254_v29 = vld [vmem:[%s801_s1 + $0x90] sm:$0xff] (!%p168_p3)  ;;  %v257_v30 = vld [vmem:[%s801_s1 + $0xa8] sm:$0xff] (!%p168_p3) }
   0xd   : > { %v259_v31 = vld [vmem:[%s801_s1 + $0xb8] sm:$0xff] (!%p168_p3)  ;;  %v534_v32 = vpack.c.bf16 (!%p168_p3), %v254_v29, %v252_v28  ;;  %v256_v34 = vld [vmem:[%s801_s1 + $0xa0] sm:$0xff] (!%p168_p3)  ;;  %v258_v35 = vld [vmem:[%s801_s1 + $0xb0] sm:$0xff] (!%p168_p3) }
   0xe   : > { %523 = vmatpush1.bf16.msra.mxu0 %v522_v14  ;;  %557 = vmatpush1.bf16.msra.mxu1 %v522_v14  ;;  %v536_v33 = vpack.c.bf16 %v259_v31, %v257_v30  ;;  %v261_v36 = vld [vmem:[%s801_s1 + $0xc8] sm:$0xff]  ;;  %v263_v37 = vld [vmem:[%s801_s1 + $0xd8] sm:$0xff]  ;;  %v538_v38 = vpack.c.bf16 %v258_v35, %v256_v34  ;;  %v260_v40 = vld [vmem:[%s801_s1 + $0xc0] sm:$0xff]  ;;  %s809_s12 = smov (!%p205_p4, %s605_s12), 1 }
   0xf   : > { %525 = vmatprep.subr.bf16.mxu0 %v524_v15  ;;  %550 = vmatprep.subr.bf16.mxu1 %v524_v15  ;;  %v540_v39 = vpack.c.bf16 %v263_v37, %v261_v36  ;;  %v262_v41 = vld [vmem:[%s801_s1 + $0xd0] sm:$0xff]  ;;  %v265_v42 = vld [vmem:[%s801_s1 + $0xe8] sm:$0xff]  ;;  %v267_v43 = vld [vmem:[%s801_s1 + $0xf8] sm:$0xff]  ;;  %s564_s7 = smul.u32 56, %s809_s12  ;;  %s512_s11 = sshll.u32 %s809_s12, 1 }
  0x10   : > { %v542_v44 = vpack.c.bf16 %v262_v41, %v260_v40  ;;  %v544_v45 = vpack.c.bf16 %v267_v43, %v265_v42  ;;  %v264_v46 = vld [vmem:[%s801_s1 + $0xe0] sm:$0xff]  ;;  %v266_v47 = vld [vmem:[%s801_s1 + $0xf0] sm:$0xff]  ;;  %s217_s18 = scalar_lea.vmem %s802_s2, %s512_s11  ;;  %s565_s19 = smul.u32 112, %s809_s12 }
  0x11   : > { %v546_v48 = vpack.c.bf16 %v266_v47, %v264_v46  ;;  %s212_s10 = scalar_lea.vmem %s800_s0, %s564_s7  ;;  %v268_v59 = vld [vmem:[%s217_s18] sm:$0x3] }
  0x12   : > { %527 = vmatpush1.bf16.msra.mxu0 %v526_v20  ;;  %558 = vmatpush1.bf16.msra.mxu1 %v526_v20  ;;  %v229_v49 = vld [vmem:[%s212_s10] sm:$0xff]  ;;  %v230_v51 = vld [vmem:[%s212_s10 + $0x8] sm:$0xff]  ;;  %v231_v53 = vld [vmem:[%s212_s10 + $0x10] sm:$0xff]  ;;  %v273_v61 = vrot.slane %v268_v59, %v272_v58  ;;  %v277_v62 = vrot.slane %v268_v59, %v276_v60  ;;  %s775_s22 = scalar_lea.vmem %s803_s3, %s565_s19 }
  0x13   : > { %529 = vmatprep.subr.bf16.mxu0 %v528_v21  ;;  %551 = vmatprep.subr.bf16.mxu1 %v528_v21  ;;  %v233_v50 = vld [vmem:[%s212_s10 + $0x20] sm:$0xff]  ;;  %v234_v52 = vld [vmem:[%s212_s10 + $0x28] sm:$0xff]  ;;  %v235_v54 = vld [vmem:[%s212_s10 + $0x30] sm:$0xff] }
  0x14   : > { %v232_v55 = vld [vmem:[%s212_s10 + $0x18] sm:$0xff] }
  0x16   : > { %531 = vmatpush1.bf16.msra.mxu0 %v530_v26  ;;  %559 = vmatpush1.bf16.msra.mxu1 %v530_v26 }
  0x17   : > { %533 = vmatprep.subr.bf16.mxu0 %v532_v27  ;;  %552 = vmatprep.subr.bf16.mxu1 %v532_v27 }
  0x1a   : > { %535 = vmatpush1.bf16.msra.mxu0 %v534_v32  ;;  %560 = vmatpush1.bf16.msra.mxu1 %v534_v32 }
  0x1b   : > { %537 = vmatprep.subr.bf16.mxu0 %v536_v33  ;;  %553 = vmatprep.subr.bf16.mxu1 %v536_v33 }
  0x1e   : > { %539 = vmatpush1.bf16.msra.mxu0 %v538_v38  ;;  %561 = vmatpush1.bf16.msra.mxu1 %v538_v38 }
  0x1f   : > { %541 = vmatprep.subr.bf16.mxu0 %v540_v39  ;;  %554 = vmatprep.subr.bf16.mxu1 %v540_v39 }
  0x22   : > { %543 = vmatpush1.bf16.msra.mxu0 %v542_v44  ;;  %562 = vmatpush1.bf16.msra.mxu1 %v542_v44 }
  0x23   : > { %545 = vmatprep.subr.bf16.mxu0 %v544_v45  ;;  %555 = vmatprep.subr.bf16.mxu1 %v544_v45 }
  0x26   : > { %547 = vmatpush1.bf16.msra.mxu0 %v546_v48  ;;  %563 = vmatpush1.bf16.msra.mxu1 %v546_v48 }
  0x29   : > { %345 = vmatmul.mubr.f32.vlgmr.msra.gmra.mrb[0].mxu0 %v229_v49  ;;  %369 = vmatmul.mubr.f32.vlgmr.msra.gmra.mrb[0].mxu1 %v233_v50 }
  0x2a   : > { %350 = vmatprep.mubr.f32.mxu0 %v615_v7  ;;  %374 = vmatprep.mubr.f32.mxu1 %v615_v7 }
  0x2d   : > { %351 = vmatmul.mubr.f32.gmra.mrb[2].mxu0 %v230_v51  ;;  %375 = vmatmul.mubr.f32.gmra.mrb[2].mxu1 %v234_v52 }
  0x2e   : > { %356 = vmatprep.mubr.f32.mxu0 %v615_v7  ;;  %380 = vmatprep.mubr.f32.mxu1 %v615_v7 }
  0x31   : > { %357 = vmatmul.mubr.f32.gmra.mrb[4].mxu0 %v231_v53  ;;  %381 = vmatmul.mubr.f32.gmra.mrb[4].mxu1 %v235_v54 }
  0x32   : > { %362 = vmatprep.mubr.f32.mxu0 %v615_v7 }
  0x35   : > { %363 = vmatmul.mubr.f32.gmra.mrb[6].mxu0 %v232_v55 }
  0xfc   : > { %v346_v63 = vpop.f32.mrb[0].mxu0  ;;  %v370_v0 = vpop.f32.mrb[0].mxu1 }
  0xfd   : > { %v347_v1 = vadd.f32 %v346_v63, %v273_v61  ;;  %v348_v2 = vpop.f32.mrb[1].mxu0  ;;  %v371_v3 = vadd.f32 %v370_v0, %v273_v61  ;;  %v372_v4 = vpop.f32.mrb[1].mxu1 }
  0xfe   : > { %v349_v5 = vadd.f32 %v348_v2, %v277_v62  ;;  %v373_v6 = vadd.f32 %v372_v4, %v277_v62 }
  0xff   : > { %387 = vst [vmem:[%s775_s22] sm:$0xff] %v347_v1  ;;  %395 = vst [vmem:[%s775_s22 + $0x40] sm:$0xff] %v371_v3 }
 0x100   : > { %388 = vst [vmem:[%s775_s22 + $0x8] sm:$0xff] %v349_v5  ;;  %v352_v7 = vpop.f32.mrb[2].mxu0  ;;  %396 = vst [vmem:[%s775_s22 + $0x48] sm:$0xff] %v373_v6  ;;  %v376_v8 = vpop.f32.mrb[2].mxu1 }
 0x101   : > { %v353_v9 = vadd.f32 %v352_v7, %v273_v61  ;;  %v354_v10 = vpop.f32.mrb[3].mxu0  ;;  %v377_v11 = vadd.f32 %v376_v8, %v273_v61  ;;  %v378_v12 = vpop.f32.mrb[3].mxu1 }
 0x102   : > { %v355_v13 = vadd.f32 %v354_v10, %v277_v62  ;;  %v379_v14 = vadd.f32 %v378_v12, %v277_v62 }
 0x103   : > { %389 = vst [vmem:[%s775_s22 + $0x10] sm:$0xff] %v353_v9  ;;  %397 = vst [vmem:[%s775_s22 + $0x50] sm:$0xff] %v377_v11 }
 0x104   : > { %390 = vst [vmem:[%s775_s22 + $0x18] sm:$0xff] %v355_v13  ;;  %v358_v15 = vpop.f32.mrb[4].mxu0  ;;  %398 = vst [vmem:[%s775_s22 + $0x58] sm:$0xff] %v379_v14  ;;  %v382_v16 = vpop.f32.mrb[4].mxu1 }
 0x105   : > { %v359_v17 = vadd.f32 %v358_v15, %v273_v61  ;;  %v360_v18 = vpop.f32.mrb[5].mxu0  ;;  %v383_v19 = vadd.f32 %v382_v16, %v273_v61  ;;  %v384_v20 = vpop.f32.mrb[5].mxu1 }
 0x106   : > { %v361_v21 = vadd.f32 %v360_v18, %v277_v62  ;;  %v385_v22 = vadd.f32 %v384_v20, %v277_v62 }
 0x107   : > { %391 = vst [vmem:[%s775_s22 + $0x20] sm:$0xff] %v359_v17  ;;  %399 = vst [vmem:[%s775_s22 + $0x60] sm:$0xff] %v383_v19 }
 0x108   : > { %392 = vst [vmem:[%s775_s22 + $0x28] sm:$0xff] %v361_v21  ;;  %v364_v23 = vpop.f32.mrb[6].mxu0  ;;  %400 = vst [vmem:[%s775_s22 + $0x68] sm:$0xff] %v385_v22 }
 0x109   : > { %v365_v24 = vadd.f32 %v364_v23, %v273_v61  ;;  %v366_v25 = vpop.f32.mrb[7].mxu0 }
 0x10a   : > { %v367_v26 = vadd.f32 %v366_v25, %v277_v62 }
 0x10b   : > { %393 = vst [vmem:[%s775_s22 + $0x30] sm:$0xff] %v365_v24 }
 0x10c   : > { %394 = vst [vmem:[%s775_s22 + $0x38] sm:$0xff] %v367_v26 }
 0x10d PF: > { %s13_s14 = sadd.s32 1, %s613_s14   ;;  %s804_s12 = smov %s609_s13 }
 0x10e   : > { %p10_p5 = scmp.ge.s32.totalorder %s13_s14, 4   ;;  %s805_s13 = smov %s807_s15 }
 0x110   :  { %12 = sbr.rel (!%p10_p5) target bundleno = 2 (0x2), region = 65 }

</bundles_post_ra>
